<compile_context>
chip_gen: v5e
topology: v5e:2x2
jax: 0.10.0
libtpu: 0.0.40
codegen_flags: <defaults>
</compile_context>

<pallas_src>
import math
import functools

import jax
import jax.numpy as jnp
from jax.experimental import pallas as pl
from jax.experimental.pallas import tpu as pltpu


# ---------------------------------------------------------------------------
# helpers
# ---------------------------------------------------------------------------

def _layernorm(x, alpha, bias, eps):
    # model.py LayerNormalization: mean / unbiased std (ddof=1) over the last
    # dim, eps added to the std (NOT to the variance).
    d = x.shape[-1]
    mean = jnp.mean(x, axis=-1, keepdims=True)
    var = jnp.sum((x - mean) ** 2, axis=-1, keepdims=True) * (1.0 / (d - 1))
    inv = pl.reciprocal(jnp.sqrt(var) + eps, approx=False)     # EUP, exact
    return alpha * (x - mean) * inv + bias


def _pick_tile(n, preferred, quantum=8):
    """Largest multiple-of-`quantum` divisor of n that is <= preferred,
    falling back to the full dimension (always a legal block shape)."""
    if n <= preferred:
        return n
    t = (preferred // quantum) * quantum
    while t >= quantum:
        if n % t == 0:
            return t
        t -= quantum
    return n


def _vmem_capacity_bytes():
    try:
        return int(pltpu.get_tpu_info().vmem_capacity_bytes)
    except Exception:
        return 64 * 2 ** 20            # v7x per-TC capacity (most restrictive)


def _vmem_limit(footprint_bytes):
    cap = _vmem_capacity_bytes()
    want = max(32 * 2 ** 20, 2 * footprint_bytes + 8 * 2 ** 20)
    return int(min(cap - 4 * 2 ** 20, want))


def _const_spec(shape, single_buffer):
    """BlockSpec for a grid-invariant operand (index map is all-zeros)."""
    idx = lambda *_: (0,) * len(shape)
    if single_buffer:
        return pl.BlockSpec(shape, idx, pipeline_mode=pl.Buffered(1))
    return pl.BlockSpec(shape, idx)


# ---------------------------------------------------------------------------
# kernel 1: LayerNorm1 + fused Q/K/V projection
# ---------------------------------------------------------------------------

def _ln_qkv_kernel(x_ref, a1_ref, b1_ref, wqkv_ref, qkv_ref, *, eps):
    x = x_ref[0]                                          # (TS, D) f32
    xn = _layernorm(x, a1_ref[...], b1_ref[...], eps).astype(jnp.bfloat16)
    qkv_ref[0] = jnp.dot(xn, wqkv_ref[...],
                         preferred_element_type=jnp.float32).astype(jnp.bfloat16)


# ---------------------------------------------------------------------------
# kernel 2: flash attention, KV streamed via grid reduction axis
#   grid = (B, h, S/TQ, S/TK), last axis "arbitrary"
# ---------------------------------------------------------------------------

def _flash_attn_kernel(q_ref, k_ref, v_ref, o_ref, m_sc, l_sc, acc_sc):
    ki = pl.program_id(3)

    @pl.when(ki == 0)
    def _():
        m_sc[...] = jnp.full_like(m_sc, -jnp.inf)
        l_sc[...] = jnp.zeros_like(l_sc)
        acc_sc[...] = jnp.zeros_like(acc_sc)

    q = q_ref[...]                                        # (TQ, d_k) bf16, pre-scaled
    k = k_ref[...]                                        # (TK, d_k) bf16 (streamed)
    v = v_ref[...]                                        # (TK, d_k) bf16 (streamed)

    # scores without materializing k.T: contract the d_k axes on the MXU.
    s = jax.lax.dot_general(q, k, (((1,), (1,)), ((), ())),
                            preferred_element_type=jnp.float32)   # (TQ, TK) f32

    m_prev = m_sc[...]
    m_new = jnp.maximum(m_prev, jnp.max(s, axis=-1, keepdims=True))
    alpha = jnp.exp(m_prev - m_new)
    p = jnp.exp(s - m_new)
    l_sc[...] = alpha * l_sc[...] + jnp.sum(p, axis=-1, keepdims=True)
    acc_sc[...] = alpha * acc_sc[...] + jnp.dot(p.astype(jnp.bfloat16), v,
                                                preferred_element_type=jnp.float32)
    m_sc[...] = m_new

    @pl.when(ki == pl.num_programs(3) - 1)
    def _():
        o_ref[...] = (acc_sc[...] * pl.reciprocal(l_sc[...], approx=True)
                      ).astype(o_ref.dtype)


# ---------------------------------------------------------------------------
# kernel 3: out-projection + residual + LayerNorm2 + chunked FFN + residual
# ---------------------------------------------------------------------------

def _out_ffn_kernel(x_ref, attn_ref, wo_ref, a2_ref, b2n_ref,
                    w1_ref, bf1_ref, w2_ref, bf2_ref, o_ref, *, eps, td):
    x = x_ref[0]                                          # (TQ, D) f32 (residual)
    n_heads = attn_ref.shape[0]

    # residual 0: x + concat(heads) @ Wo, as h leading-dim-sliced dense dots
    # (head slices are along a major dim -> no relayouts / masked loads).
    y = x
    for hi in range(n_heads):
        y = y + jnp.dot(attn_ref[hi], wo_ref[hi],
                        preferred_element_type=jnp.float32)

    # residual 1: y + FFN(LN2(y)), chunked over d_ff (the (TQ, d_ff)
    # intermediate is never materialized).
    xn = _layernorm(y, a2_ref[...], b2n_ref[...], eps).astype(jnp.bfloat16)
    d_ff = w1_ref.shape[-1]
    n_chunks = d_ff // td

    def ffn_chunk(start):
        h1 = (jnp.dot(xn, w1_ref[:, pl.ds(start, td)],
                      preferred_element_type=jnp.float32)
              + bf1_ref[:, pl.ds(start, td)])
        h1 = jnp.maximum(h1, 0.0).astype(jnp.bfloat16)            # relu
        return jnp.dot(h1, w2_ref[pl.ds(start, td), :],
                       preferred_element_type=jnp.float32)

    if n_chunks == 1:
        ff = ffn_chunk(0)
    else:
        def body(c, ff):
            return ff + ffn_chunk(pl.multiple_of(c * td, td))
        ff = jax.lax.fori_loop(0, n_chunks, body, jnp.zeros_like(y))

    o_ref[0] = y + ff + bf2_ref[...]


# ---------------------------------------------------------------------------
# wrapper
# ---------------------------------------------------------------------------

def encoder_block(x, params, *, h, eps=1e-6, single_buffer_weights=True):
    B, S, D = x.shape
    assert D % h == 0, "d_model must be divisible by h"
    d_k = D // h
    d_ff = params["w1"].shape[1]
    scale = 1.0 / math.sqrt(d_k)
    sb = single_buffer_weights

    TS = _pick_tile(S, 512)        # kernel-1 seq tile (HBM-bound: big tiles)
    TQ = _pick_tile(S, 256)        # query tile for kernels 2 & 3
    TK = _pick_tile(S, 256)        # streamed KV tile (grid reduction axis)
    TD = _pick_tile(d_ff, 512)     # in-kernel d_ff chunk

    bf16 = jnp.bfloat16
    # fused QKV weight (score scale folded into Wq) and head-major Wo
    wqkv = jnp.concatenate([params["wq"] * scale, params["wk"], params["wv"]],
                           axis=1).astype(bf16)                    # (D, 3D)
    wo_hm = params["wo"].reshape(h, d_k, D).astype(bf16)           # (h, d_k, D)
    w1 = params["w1"].astype(bf16)
    w2 = params["w2"].astype(bf16)
    b1, b2 = params["b1"], params["b2"]
    a1, be1 = params["alpha1"], params["bias1"]
    a2, be2 = params["alpha2"], params["bias2"]

    # ---------------- kernel 1: LN1 + fused QKV ----------------
    fp1 = (2 * TS * D * 4
           + (1 if sb else 2) * D * 3 * D * 2
           + 2 * TS * 3 * D * 2 + 4 * D * 4)
    qkv = pl.pallas_call(
        functools.partial(_ln_qkv_kernel, eps=eps),
        out_shape=jax.ShapeDtypeStruct((B, S, 3 * D), bf16),
        grid=(B, S // TS),
        in_specs=[
            pl.BlockSpec((1, TS, D), lambda b, i: (b, i, 0)),      # x
            _const_spec((1, D), sb),                               # alpha1
            _const_spec((1, D), sb),                               # bias1
            _const_spec((D, 3 * D), sb),                           # wqkv
        ],
        out_specs=pl.BlockSpec((1, TS, 3 * D), lambda b, i: (b, i, 0)),
        compiler_params=pltpu.CompilerParams(
            dimension_semantics=("parallel", "parallel"),
            vmem_limit_bytes=_vmem_limit(fp1)),
        cost_estimate=pl.CostEstimate(
            flops=6 * B * S * D * D, transcendentals=0,
            bytes_accessed=B * S * D * 4 + 3 * D * D * 2 + 3 * B * S * D * 2),
    )(x, a1, be1, wqkv)

    # layout plumbing (single XLA copy): packed (B, S, 3, h, d_k) ->
    # head-major (3, B, h, S, d_k), so attention blocks are lane-dense and
    # head slices live on major dims.
    # TODO(synk): emit head-major directly from kernel 1 to drop this pass.
    qkv_hm = qkv.reshape(B, S, 3, h, d_k).transpose(2, 0, 3, 1, 4)

    # ---------------- kernel 2: flash attention (KV streamed) ----------------
    fp2 = (2 * TQ * d_k * 2 + 4 * TK * d_k * 2 + 2 * TQ * d_k * 2
           + TQ * (d_k + 2) * 4)
    attn = pl.pallas_call(
        _flash_attn_kernel,
        out_shape=jax.ShapeDtypeStruct((B, h, S, d_k), bf16),
        grid=(B, h, S // TQ, S // TK),
        in_specs=[
            pl.BlockSpec((None, None, None, TQ, d_k),
                         lambda b, hi, qi, ki: (0, b, hi, qi, 0)),   # q
            pl.BlockSpec((None, None, None, TK, d_k),
                         lambda b, hi, qi, ki: (1, b, hi, ki, 0)),   # k tile
            pl.BlockSpec((None, None, None, TK, d_k),
                         lambda b, hi, qi, ki: (2, b, hi, ki, 0)),   # v tile
        ],
        out_specs=pl.BlockSpec((None, None, TQ, d_k),
                               lambda b, hi, qi, ki: (b, hi, qi, 0)),
        scratch_shapes=[pltpu.VMEM((TQ, 1), jnp.float32),            # m
                        pltpu.VMEM((TQ, 1), jnp.float32),            # l
                        pltpu.VMEM((TQ, d_k), jnp.float32)],         # acc
        compiler_params=pltpu.CompilerParams(
            dimension_semantics=("parallel", "parallel", "parallel", "arbitrary"),
            vmem_limit_bytes=_vmem_limit(fp2)),
        cost_estimate=pl.CostEstimate(
            flops=4 * B * S * S * D,
            transcendentals=2 * B * h * S * S,
            bytes_accessed=(2 * B * S * D * 2                       # q in, o out
                            + 2 * (S // TQ) * B * S * D * 2)),      # k+v re-reads
    )(qkv_hm, qkv_hm, qkv_hm)

    # ---------------- kernel 3: out-proj + residual + LN2 + FFN + residual ----
    fp3 = (2 * TQ * D * 4 + 2 * h * TQ * d_k * 2
           + (1 if sb else 2) * (h * d_k * D + 2 * D * d_ff) * 2
           + 2 * TQ * D * 4 + (3 * D + d_ff) * 4)
    out = pl.pallas_call(
        functools.partial(_out_ffn_kernel, eps=eps, td=TD),
        out_shape=jax.ShapeDtypeStruct((B, S, D), jnp.float32),
        grid=(B, S // TQ),
        in_specs=[
            pl.BlockSpec((1, TQ, D), lambda b, i: (b, i, 0)),        # x residual
            pl.BlockSpec((None, h, TQ, d_k), lambda b, i: (b, 0, i, 0)),  # heads
            _const_spec((h, d_k, D), sb),                            # wo (head-major)
            _const_spec((1, D), sb),                                 # alpha2
            _const_spec((1, D), sb),                                 # bias2
            _const_spec((D, d_ff), sb),                              # w1
            _const_spec((1, d_ff), sb),                              # b1
            _const_spec((d_ff, D), sb),                              # w2
            _const_spec((1, D), sb),                                 # b2
        ],
        out_specs=pl.BlockSpec((1, TQ, D), lambda b, i: (b, i, 0)),
        compiler_params=pltpu.CompilerParams(
            dimension_semantics=("parallel", "parallel"),
            vmem_limit_bytes=_vmem_limit(fp3)),
        cost_estimate=pl.CostEstimate(
            flops=2 * B * S * D * D + 4 * B * S * D * d_ff,
            transcendentals=0,
            bytes_accessed=(2 * B * S * D * 4 + B * S * D * 2
                            + (D * D + 2 * D * d_ff) * 2)),
    )(x, attn, wo_hm, a2, be2, w1, b1, w2, b2)

    return out


# ---------------------------------------------------------------------------
# pure-JAX f32 reference (mirrors the PyTorch forward, dropout = identity)
# ---------------------------------------------------------------------------

def encoder_block_ref(x, params, *, h, eps=1e-6):
    def ln(x, a, b):
        d = x.shape[-1]
        mean = jnp.mean(x, axis=-1, keepdims=True)
        std = jnp.sqrt(jnp.sum((x - mean) ** 2, axis=-1, keepdims=True) / (d - 1))
        return a * (x - mean) / (std + eps) + b

    B, S, D = x.shape
    d_k = D // h

    xn = ln(x, params["alpha1"][0], params["bias1"][0])
    q = xn @ params["wq"]
    k = xn @ params["wk"]
    v = xn @ params["wv"]
    q = q.reshape(B, S, h, d_k).transpose(0, 2, 1, 3)
    k = k.reshape(B, S, h, d_k).transpose(0, 2, 1, 3)
    v = v.reshape(B, S, h, d_k).transpose(0, 2, 1, 3)
    scores = jnp.einsum("bhqd,bhkd->bhqk", q, k) / math.sqrt(d_k)
    p = jax.nn.softmax(scores, axis=-1)
    attn = jnp.einsum("bhqk,bhkd->bhqd", p, v)
    attn = attn.transpose(0, 2, 1, 3).reshape(B, S, D)
    x = x + attn @ params["wo"]

    xn = ln(x, params["alpha2"][0], params["bias2"][0])
    hff = jnp.maximum(xn @ params["w1"] + params["b1"][0], 0.0)
    return x + hff @ params["w2"] + params["b2"][0]


def init_params(key, d_model, d_ff):
    ks = jax.random.split(key, 8)
    n = lambda k, shp: (0.05 * jax.random.normal(k, shp)).astype(jnp.float32)
    return {
        # stored pre-transposed: (in, out)
        "wq": n(ks[0], (d_model, d_model)),
        "wk": n(ks[1], (d_model, d_model)),
        "wv": n(ks[2], (d_model, d_model)),
        "wo": n(ks[3], (d_model, d_model)),
        "w1": n(ks[4], (d_model, d_ff)),
        "b1": n(ks[5], (1, d_ff)),
        "w2": n(ks[6], (d_ff, d_model)),
        "b2": n(ks[7], (1, d_model)),
        # LayerNorm params (torch init: ones / zeros)
        "alpha1": jnp.ones((1, d_model), jnp.float32),
        "bias1": jnp.zeros((1, d_model), jnp.float32),
        "alpha2": jnp.ones((1, d_model), jnp.float32),
        "bias2": jnp.zeros((1, d_model), jnp.float32),
    }


if __name__ == "__main__":
    # TODO(synk): nn.Dropout layers are identity here (inference semantics).
    B, S, d_model, h, d_ff = 2, 8, 32, 4, 64

    key = jax.random.PRNGKey(0)
    kx, kp = jax.random.split(key)
    x = jax.random.normal(kx, (B, S, d_model), dtype=jnp.float32)
    params = init_params(kp, d_model, d_ff)

    try:
        out = jax.block_until_ready(
            encoder_block(x, params, h=h, single_buffer_weights=True))
    except Exception:
        # pipeline_mode=pl.Buffered(1) is a pure VMEM-footprint optimization;
        # if this jax build rejects it, rerun with default double-buffering.
        out = jax.block_until_ready(
            encoder_block(x, params, h=h, single_buffer_weights=False))

    ref = encoder_block_ref(x, params, h=h)
    assert out.shape == (B, S, d_model)
    # matmul operands run in bf16 (f32 accumulation) -> bf16-appropriate
    # tolerance against the f32 reference.
    assert jnp.allclose(out, ref, rtol=2e-2, atol=2e-2), "mismatch vs reference"

    print("KERNEL_OK")
</pallas_src>

<mosaic_0001>
module attributes {stable_mosaic.version = 11 : i64} {
  func.func @_ln_qkv_kernel(%arg0: i32, %arg1: i32, %arg2: memref<1x8x32xf32, #tpu.memory_space<vmem>>, %arg3: memref<1x32xf32, #tpu.memory_space<vmem>>, %arg4: memref<1x32xf32, #tpu.memory_space<vmem>>, %arg5: memref<32x96xbf16, #tpu.memory_space<vmem>>, %arg6: memref<1x8x96xbf16, #tpu.memory_space<vmem>>) attributes {dimension_semantics = [#tpu.dimension_semantics<parallel>, #tpu.dimension_semantics<parallel>], iteration_bounds = array<i64: 2, 1>, scalar_prefetch = 0 : i64, scratch_operands = 0 : i64, tpu.core_type = #tpu.core_type<tc>, window_params = [{transform_indices = @transform_0, window_bounds = array<i64: 1, 8, 32>}, {pipeline_mode = #tpu.pipeline_mode<synchronous>, transform_indices = @transform_1, window_bounds = array<i64: 1, 32>}, {pipeline_mode = #tpu.pipeline_mode<synchronous>, transform_indices = @transform_2, window_bounds = array<i64: 1, 32>}, {pipeline_mode = #tpu.pipeline_mode<synchronous>, transform_indices = @transform_3, window_bounds = array<i64: 32, 96>}, {transform_indices = @transform_4, window_bounds = array<i64: 1, 8, 96>}]} {
    %c0 = arith.constant 0 : index
    %c0_0 = arith.constant 0 : index
    %c0_1 = arith.constant 0 : index
    %0 = vector.load %arg2[%c0, %c0_0, %c0_1] : memref<1x8x32xf32, #tpu.memory_space<vmem>>, vector<1x8x32xf32>
    %1 = vector.shape_cast %0 : vector<1x8x32xf32> to vector<8x32xf32>
    %c0_2 = arith.constant 0 : index
    %c0_3 = arith.constant 0 : index
    %2 = vector.load %arg3[%c0_2, %c0_3] : memref<1x32xf32, #tpu.memory_space<vmem>>, vector<1x32xf32>
    %c0_4 = arith.constant 0 : index
    %c0_5 = arith.constant 0 : index
    %3 = vector.load %arg4[%c0_4, %c0_5] : memref<1x32xf32, #tpu.memory_space<vmem>>, vector<1x32xf32>
    %cst = arith.constant dense<0.000000e+00> : vector<8xf32>
    %4 = vector.multi_reduction <add>, %1, %cst [1] : vector<8x32xf32> to vector<8xf32>
    %5 = vector.shape_cast %4 : vector<8xf32> to vector<8x1xf32>
    %cst_6 = arith.constant 3.200000e+01 : f32
    %6 = vector.broadcast %cst_6 : f32 to vector<8x1xf32>
    %7 = arith.divf %5, %6 : vector<8x1xf32>
    %8 = vector.broadcast %7 : vector<8x1xf32> to vector<8x32xf32>
    %9 = arith.subf %1, %8 : vector<8x32xf32>
    %10 = arith.mulf %9, %9 : vector<8x32xf32>
    %cst_7 = arith.constant dense<0.000000e+00> : vector<8xf32>
    %11 = vector.multi_reduction <add>, %10, %cst_7 [1] : vector<8x32xf32> to vector<8xf32>
    %12 = vector.shape_cast %11 : vector<8xf32> to vector<8x1xf32>
    %cst_8 = arith.constant 0.0322580636 : f32
    %13 = vector.broadcast %cst_8 : f32 to vector<8x1xf32>
    %14 = arith.mulf %12, %13 : vector<8x1xf32>
    %15 = math.sqrt %14 : vector<8x1xf32>
    %cst_9 = arith.constant 9.99999997E-7 : f32
    %16 = vector.broadcast %cst_9 : f32 to vector<8x1xf32>
    %17 = arith.addf %15, %16 : vector<8x1xf32>
    %18 = tpu.reciprocal %17 : vector<8x1xf32> -> vector<8x1xf32>
    %19 = vector.broadcast %7 : vector<8x1xf32> to vector<8x32xf32>
    %20 = arith.subf %1, %19 : vector<8x32xf32>
    %21 = vector.broadcast %2 : vector<1x32xf32> to vector<8x32xf32>
    %22 = arith.mulf %21, %20 : vector<8x32xf32>
    %23 = vector.broadcast %18 : vector<8x1xf32> to vector<8x32xf32>
    %24 = arith.mulf %22, %23 : vector<8x32xf32>
    %25 = vector.broadcast %3 : vector<1x32xf32> to vector<8x32xf32>
    %26 = arith.addf %24, %25 : vector<8x32xf32>
    %27 = arith.truncf %26 : vector<8x32xf32> to vector<8x32xbf16>
    %c0_10 = arith.constant 0 : index
    %c0_11 = arith.constant 0 : index
    %28 = vector.load %arg5[%c0_10, %c0_11] : memref<32x96xbf16, #tpu.memory_space<vmem>>, vector<32x96xbf16>
    %cst_12 = arith.constant dense<0.000000e+00> : vector<8x96xf32>
    %29 = tpu.matmul %27, %28, %cst_12 {dimension_numbers = #tpu.dot_dimension_numbers<[1], [0], [0], [1], [0, 0, 1, 1], [], []>} : vector<8x32xbf16>, vector<32x96xbf16>, vector<8x96xf32> -> vector<8x96xf32>
    %30 = arith.truncf %29 : vector<8x96xf32> to vector<8x96xbf16>
    %c0_13 = arith.constant 0 : index
    %c0_14 = arith.constant 0 : index
    %c0_15 = arith.constant 0 : index
    %31 = vector.load %arg6[%c0_13, %c0_14, %c0_15] : memref<1x8x96xbf16, #tpu.memory_space<vmem>>, vector<1x8x96xbf16>
    %32 = vector.shape_cast %31 : vector<1x8x96xbf16> to vector<8x96xbf16>
    %33 = vector.shape_cast %30 : vector<8x96xbf16> to vector<1x8x96xbf16>
    tpu.vector_store %arg6[%c0_13, %c0_14, %c0_15], %33 {strides = array<i32>} : memref<1x8x96xbf16, #tpu.memory_space<vmem>>, vector<1x8x96xbf16>,
    return
  }
  func.func @transform_0(%arg0: i32, %arg1: i32) -> (i32, i32, i32) {
    %c0_i32 = arith.constant 0 : i32
    %c0_i32_0 = arith.constant 0 : i32
    return %arg0, %arg1, %c0_i32 : i32, i32, i32
  }
  func.func @transform_1(%arg0: i32, %arg1: i32) -> (i32, i32) {
    %c0_i32 = arith.constant 0 : i32
    %c0_i32_0 = arith.constant 0 : i32
    %c0_i32_1 = arith.constant 0 : i32
    return %c0_i32, %c0_i32_0 : i32, i32
  }
  func.func @transform_2(%arg0: i32, %arg1: i32) -> (i32, i32) {
    %c0_i32 = arith.constant 0 : i32
    %c0_i32_0 = arith.constant 0 : i32
    %c0_i32_1 = arith.constant 0 : i32
    return %c0_i32, %c0_i32_0 : i32, i32
  }
  func.func @transform_3(%arg0: i32, %arg1: i32) -> (i32, i32) {
    %c0_i32 = arith.constant 0 : i32
    %c0_i32_0 = arith.constant 0 : i32
    %c0_i32_1 = arith.constant 0 : i32
    return %c0_i32, %c0_i32_0 : i32, i32
  }
  func.func @transform_4(%arg0: i32, %arg1: i32) -> (i32, i32, i32) {
    %c0_i32 = arith.constant 0 : i32
    %c0_i32_0 = arith.constant 0 : i32
    return %arg0, %arg1, %c0_i32 : i32, i32, i32
  }
}

module attributes {stable_mosaic.version = 11 : i64} {
  func.func @_ln_qkv_kernel(%arg0: i32, %arg1: i32, %arg2: memref<1x8x32xf32, #tpu.memory_space<vmem>>, %arg3: memref<1x32xf32, #tpu.memory_space<vmem>>, %arg4: memref<1x32xf32, #tpu.memory_space<vmem>>, %arg5: memref<32x96xbf16, #tpu.memory_space<vmem>>, %arg6: memref<1x8x96xbf16, #tpu.memory_space<vmem>>) attributes {dimension_semantics = [#tpu.dimension_semantics<parallel>, #tpu.dimension_semantics<parallel>], iteration_bounds = array<i64: 2, 1>, scalar_prefetch = 0 : i64, scratch_operands = 0 : i64, tpu.core_type = #tpu.core_type<tc>, window_params = [{transform_indices = @transform_0, window_bounds = array<i64: 1, 8, 32>}, {pipeline_mode = #tpu.pipeline_mode<synchronous>, transform_indices = @transform_1, window_bounds = array<i64: 1, 32>}, {pipeline_mode = #tpu.pipeline_mode<synchronous>, transform_indices = @transform_2, window_bounds = array<i64: 1, 32>}, {pipeline_mode = #tpu.pipeline_mode<synchronous>, transform_indices = @transform_3, window_bounds = array<i64: 32, 96>}, {transform_indices = @transform_4, window_bounds = array<i64: 1, 8, 96>}]} {
    %c0 = arith.constant 0 : index
    %c0_0 = arith.constant 0 : index
    %c0_1 = arith.constant 0 : index
    %0 = vector.load %arg2[%c0, %c0_0, %c0_1] : memref<1x8x32xf32, #tpu.memory_space<vmem>>, vector<1x8x32xf32>
    %1 = vector.shape_cast %0 : vector<1x8x32xf32> to vector<8x32xf32>
    %c0_2 = arith.constant 0 : index
    %c0_3 = arith.constant 0 : index
    %2 = vector.load %arg3[%c0_2, %c0_3] : memref<1x32xf32, #tpu.memory_space<vmem>>, vector<1x32xf32>
    %c0_4 = arith.constant 0 : index
    %c0_5 = arith.constant 0 : index
    %3 = vector.load %arg4[%c0_4, %c0_5] : memref<1x32xf32, #tpu.memory_space<vmem>>, vector<1x32xf32>
    %cst = arith.constant dense<0.000000e+00> : vector<8xf32>
    %4 = vector.multi_reduction <add>, %1, %cst [1] : vector<8x32xf32> to vector<8xf32>
    %5 = vector.shape_cast %4 : vector<8xf32> to vector<8x1xf32>
    %cst_6 = arith.constant 3.200000e+01 : f32
    %6 = vector.broadcast %cst_6 : f32 to vector<8x1xf32>
    %7 = arith.divf %5, %6 : vector<8x1xf32>
    %8 = vector.broadcast %7 : vector<8x1xf32> to vector<8x32xf32>
    %9 = arith.subf %1, %8 : vector<8x32xf32>
    %10 = arith.mulf %9, %9 : vector<8x32xf32>
    %cst_7 = arith.constant dense<0.000000e+00> : vector<8xf32>
    %11 = vector.multi_reduction <add>, %10, %cst_7 [1] : vector<8x32xf32> to vector<8xf32>
    %12 = vector.shape_cast %11 : vector<8xf32> to vector<8x1xf32>
    %cst_8 = arith.constant 0.0322580636 : f32
    %13 = vector.broadcast %cst_8 : f32 to vector<8x1xf32>
    %14 = arith.mulf %12, %13 : vector<8x1xf32>
    %15 = math.sqrt %14 : vector<8x1xf32>
    %cst_9 = arith.constant 9.99999997E-7 : f32
    %16 = vector.broadcast %cst_9 : f32 to vector<8x1xf32>
    %17 = arith.addf %15, %16 : vector<8x1xf32>
    %18 = tpu.reciprocal %17 : vector<8x1xf32> -> vector<8x1xf32>
    %19 = vector.broadcast %7 : vector<8x1xf32> to vector<8x32xf32>
    %20 = arith.subf %1, %19 : vector<8x32xf32>
    %21 = vector.broadcast %2 : vector<1x32xf32> to vector<8x32xf32>
    %22 = arith.mulf %21, %20 : vector<8x32xf32>
    %23 = vector.broadcast %18 : vector<8x1xf32> to vector<8x32xf32>
    %24 = arith.mulf %22, %23 : vector<8x32xf32>
    %25 = vector.broadcast %3 : vector<1x32xf32> to vector<8x32xf32>
    %26 = arith.addf %24, %25 : vector<8x32xf32>
    %27 = arith.truncf %26 : vector<8x32xf32> to vector<8x32xbf16>
    %c0_10 = arith.constant 0 : index
    %c0_11 = arith.constant 0 : index
    %28 = vector.load %arg5[%c0_10, %c0_11] : memref<32x96xbf16, #tpu.memory_space<vmem>>, vector<32x96xbf16>
    %cst_12 = arith.constant dense<0.000000e+00> : vector<8x96xf32>
    %29 = tpu.matmul %27, %28, %cst_12 {dimension_numbers = #tpu.dot_dimension_numbers<[1], [0], [0], [1], [0, 0, 1, 1], [], []>} : vector<8x32xbf16>, vector<32x96xbf16>, vector<8x96xf32> -> vector<8x96xf32>
    %30 = arith.truncf %29 : vector<8x96xf32> to vector<8x96xbf16>
    %c0_13 = arith.constant 0 : index
    %c0_14 = arith.constant 0 : index
    %c0_15 = arith.constant 0 : index
    %31 = vector.load %arg6[%c0_13, %c0_14, %c0_15] : memref<1x8x96xbf16, #tpu.memory_space<vmem>>, vector<1x8x96xbf16>
    %32 = vector.shape_cast %31 : vector<1x8x96xbf16> to vector<8x96xbf16>
    %33 = vector.shape_cast %30 : vector<8x96xbf16> to vector<1x8x96xbf16>
    tpu.vector_store %arg6[%c0_13, %c0_14, %c0_15], %33 {strides = array<i32>} : memref<1x8x96xbf16, #tpu.memory_space<vmem>>, vector<1x8x96xbf16>,
    return
  }
  func.func @transform_0(%arg0: i32, %arg1: i32) -> (i32, i32, i32) {
    %c0_i32 = arith.constant 0 : i32
    %c0_i32_0 = arith.constant 0 : i32
    return %arg0, %arg1, %c0_i32 : i32, i32, i32
  }
  func.func @transform_1(%arg0: i32, %arg1: i32) -> (i32, i32) {
    %c0_i32 = arith.constant 0 : i32
    %c0_i32_0 = arith.constant 0 : i32
    %c0_i32_1 = arith.constant 0 : i32
    return %c0_i32, %c0_i32_0 : i32, i32
  }
  func.func @transform_2(%arg0: i32, %arg1: i32) -> (i32, i32) {
    %c0_i32 = arith.constant 0 : i32
    %c0_i32_0 = arith.constant 0 : i32
    %c0_i32_1 = arith.constant 0 : i32
    return %c0_i32, %c0_i32_0 : i32, i32
  }
  func.func @transform_3(%arg0: i32, %arg1: i32) -> (i32, i32) {
    %c0_i32 = arith.constant 0 : i32
    %c0_i32_0 = arith.constant 0 : i32
    %c0_i32_1 = arith.constant 0 : i32
    return %c0_i32, %c0_i32_0 : i32, i32
  }
  func.func @transform_4(%arg0: i32, %arg1: i32) -> (i32, i32, i32) {
    %c0_i32 = arith.constant 0 : i32
    %c0_i32_0 = arith.constant 0 : i32
    return %arg0, %arg1, %c0_i32 : i32, i32, i32
  }
}

</mosaic_0001>

<bundles_post_ra>
// kernel: tpu_custom_call.1
= control target key start
LH: loop header
LB: loop body
LE: loop exit
PB: predicated region body
PF: predicated region fallthrough
CT: control target
= control target key end

     0   :  { %9 = vsyncpa [#allocation3], 0  ;;  %s956_s0 = inlined_call_operand.hbm [shape: f32[2,8,32], index: 0, kind: input, shape index: {}]   ;;  %s957_s1 = inlined_call_operand.hbm [shape: f32[1,32], index: 1, kind: input, shape index: {}]   ;;  %s958_s2 = inlined_call_operand.vmem [shape: f32[1,32], index: 2, kind: input, shape index: {}]   ;;  %s959_s3 = inlined_call_operand.hbm [shape: bf16[32,96], index: 3, kind: input, shape index: {}]   ;;  %s960_s4 = inlined_call_operand.hbm [shape: bf16[2,8,96], index: 4, kind: output, shape index: {}]  }
   0x1   :  { %11 = vsyncpa [#allocation3 + $0x1], 0 }
   0x2   :  { %12 = vsyncpa [#allocation6], 0 }
   0x3   :  { %13 = vsyncpa [#allocation4], 0 }
   0x4   :  { %15 = vsyncpa [#allocation4 + $0x1], 0  ;;  %s803_s15 = smov 0   ;;  %s805_s16 = smov 0  }
   0x5   :  { %s807_s17 = smov 0   ;;  %s809_s18 = smov 0  }
   0x6   :  { %s811_s19 = smov 0   ;;  %s813_s20 = smov 0  }
   0x7 LB: > { %s473_s21 = sadd.s32 4294967295, %s771_s20   ;;  %s474_s22 = sadd.s32 4294967294, %s771_s20   ;;  %s771_s20 = sphi %s813_s20, %s21_s20   ;;  %s767_s19 = sphi %s811_s19, %s970_s19   ;;  %s763_s18 = sphi %s809_s18, %s969_s18   ;;  %s759_s17 = sphi %s807_s17, %s968_s17   ;;  %s755_s16 = sphi %s805_s16, %s967_s16   ;;  %s751_s15 = sphi %s803_s15, %s966_s15  }
   0x8   : > { %p55_p0 = scmp.ne.s32.totalorder %s755_s16, %s751_s15  ;;  %p839_p1 = scmp.eq.s32.totalorder %s473_s21, 0 }
   0x9   : > { %p150_p2 = scmp.eq.s32.totalorder %s474_s22, 1  ;;  %p475_p4 = scmp.ge.s32.totalorder %s771_s20, 1 }
   0xa   : > { %p845_p3 = por %p839_p1, %p55_p0  ;;  %p157_p6 = scmp.lt.s32.totalorder %s771_s20, 3 }
   0xb   : > { %p850_p5 = por %p150_p2, %p55_p0  ;;  %s169_s28 = sshll.u32 %s957_s1, 4  ;;  %s170_s28 = int_to_ptr.hbm [resolvable:$true] %s169_s28 }
   0xc   : > { %p858_p7 = pnand %p475_p4, %p157_p6  ;;  %p478_p8 = scmp.ge.s32.totalorder %s771_s20, 2 }
   0xd   : > { %s773_s30 = smov [#allocation5]   ;;  %s183_s8 = sshll.u32 %s959_s3, 4  ;;  %s184_s8 = int_to_ptr.hbm [resolvable:$true] %s183_s8 }
   0xe   : > { %p513_p9 = pneg %p858_p7  ;;  %s171_s5 = sshll.u32 %s773_s30, 4  ;;  %s172_s5 = int_to_ptr.vmem [resolvable:$true] %s171_s5 }
   0xf   : > { %s774_s9 = smov [#allocation7]   ;;  %s775_s11 = smov 64  }
  0x10   : > { %p514_p10 = pnand %p513_p9, %p839_p1  ;;  %s185_s10 = sshll.u32 %s774_s9, 4  ;;  %s186_s10 = int_to_ptr.vmem [resolvable:$true] %s185_s10 }
  0x11   : > { %s776_s12 = smov 4   ;;  %p144_p11 = scmp.eq.s32.totalorder %s473_s21, 1 }
  0x12   : > { %516 = dma.hbm_to_vmem [thread:$0]  (!%p514_p10), %s170_s28, 16, %s172_s5, [#allocation6]  }
  0x13   : > { %519 = dma.hbm_to_vmem [thread:$0]  (!%p514_p10), %s184_s8, 256, %s186_s10, [#allocation6], %s775_s11, %s775_s11, %s776_s12  }
  0x14   : > { %s33_s13 = sadd.s32 1, %s767_s19  ;;  %s42_s14 = sadd.s32 1, %s759_s17 }
  0x15   : > { %p35_p12 = scmp.ge.s32.totalorder %s33_s13, 2  ;;  %p49_p13 = scmp.ne.s32.totalorder %s759_s17, %s755_s16 }
  0x16   : > { %p50_p0 = scmp.eq.s32.totalorder %s771_s20, 0  ;;  %p530_p4 = scmp.lt.s32.totalorder %s771_s20, 2 }
  0x17   : > { %s972_s13 = smov (%p35_p12, %s33_s13), 0  ;;  %p879_p2 = por %p144_p11, %p49_p13 }
  0x18   : > { %s37_s26 = ssub.s32 %s767_s19, %s972_s13  ;;  %s199_s27 = sand.u32 1, %s759_s17  }
  0x19   : > { %p40_p6 = scmp.eq.s32.totalorder %s37_s26, 0  ;;  %p51_p9 = por %p50_p0, %p49_p13 }
  0x1a   : > { %s479_s28 = sshll.u32 %s199_s27, 3  ;;  %s480_s21 = sshll.u32 %s767_s19, 3 }
  0x1b   : > { %s889_s30 = scalar_select %p40_p6, %s759_s17, %s42_s14  }
  0x1c   : > { %s208_s7 = scalar_lea.hbm %s956_s0, %s480_s21  ;;  %s203_s9 = scalar_lea.vmem [#allocation2], %s479_s28 }
  0x1d   : > { %s210_s8 = sshll.u32 %s208_s7, 4  ;;  %s212_s10 = sshll.u32 %s203_s9, 4  ;;  %s211_s8 = int_to_ptr.hbm [resolvable:$true] %s210_s8  ;;  %s213_s10 = int_to_ptr.vmem [resolvable:$true] %s212_s10 }
  0x1e   : > { %p521_p10 = pnand %p530_p4, %p51_p9  ;;  %s200_s11 = scalar_lea.sflag [#allocation3], %s199_s27 }
  0x1f   : > { %221 = sbr.rel (%p858_p7) target bundleno = 462 (0x1ce), region = 36  ;;  %s899_s12 = sand.u32 (!%p858_p7), 1, %s755_s16  }
  0x20   : > { %523 = dma.hbm_to_vmem [thread:$0]  (!%p521_p10), %s211_s8, 128, %s213_s10, %s200_s11  }
  0x21   : > { %s482_s14 = sshll.u32 (!%p858_p7), %s899_s12, 3  ;;  %s224_s26 = scalar_lea.sflag (!%p858_p7), [#allocation3], %s899_s12 }
  0x22   : > { %s227_s21 = scalar_lea.vmem (!%p858_p7), [#allocation2], %s482_s14 }
  0x24   : > { %738 = dma.done.wait (%p845_p3), %s224_s26, 128  }
  0x25   : > { %740 = vsyncadd (%p845_p3), %s224_s26, 4294967168 }
  0x26   : > { %742 = dma.done.wait (%p839_p1), [#allocation6], 272  }
  0x27   : > { %744 = vsyncadd (%p839_p1), [#allocation6], 4294967024  ;;  %vm267_vm0 = vcmask 261120   ;;  %v264_v0 = vld [vmem:[%s227_s21] sm:$0xff]  ;;  %v777_v2 = vmov 32.0   ;;  %v499_v15 = vld [vmem:[#allocation7] sm:$0xff] }
  0x28   : > { %v268_v1 = vsel %vm267_vm0, %v264_v0, 0.0  ;;  %589 = vrcp.f32 %v777_v2  ;;  %v500_v14 = vld [vmem:[#allocation7 + $0x8] sm:$0xff]  ;;  %v587_v33 = vld [vmem:[#allocation5] ss:$0 sm:$0xff]  ;;  %s496_s29 = sshll.u32 %s763_s18, 2  ;;  %s485_s27 = sshll.u32 %s899_s12, 2 }
  0x29   : > { %269 = vadd.xlane.f32.xlu0 %v268_v1  ;;  %347 = vmatpush.bf16.msra.mxu0 %v500_v14  ;;  %v588_v40 = vld [vmem:[%s958_s2] ss:$0 sm:$0xff]  ;;  %s369_s6 = scalar_lea.hbm %s960_s4, %s496_s29  ;;  %s262_s7 = scalar_lea.vmem [#allocation8], %s485_s27  ;;  %vm355_vm8 = vcmask 781312  }
  0x2a   : > { %s371_s8 = sshll.u32 %s262_s7, 4  ;;  %s373_s9 = sshll.u32 %s369_s6, 4  ;;  %s372_s8 = int_to_ptr.vmem [resolvable:$true] %s371_s8  ;;  %s374_s9 = int_to_ptr.hbm [resolvable:$true] %s373_s9 }
  0x2b   : > { %s358_s10 = scalar_lea.sflag [#allocation4], %s899_s12  ;;  %s699_s11 = sshra.s32 %s374_s9, 4  ;;  %s700_s11 = int_to_ptr.hbm [resolvable:$true] %s699_s11 }
  0x2c   : > { %s701_s14 = scalar_lea.hbm %s700_s11, 4  ;;  %s705_s21 = scalar_lea.hbm %s960_s4, 8 }
  0x2d   : > { %348 = vmatpush.bf16.msra.mxu0 %v499_v15  ;;  %p702_p1 = scmp.ne.s32.totalorder %s700_s11, %s701_s14  ;;  %p706_p11 = scmp.lt.s32.totalorder %s700_s11, %s960_s4 }
  0x2e   : > { %v590_v3 = vpop.eup %589  ;;  %p707_p12 = scmp.lt.s32.totalorder %s705_s21, %s701_s14 }
  0x2f   : > { %v272_v4 = vmul.f32 32.0, %v590_v3  ;;  %vm276_vm1 = vweird.f32 %v590_v3  ;;  %p703_p3 = pnand %p702_p1, %p879_p2 }
  0x30   : > { %p708_p13 = por %p707_p12, %p706_p11 }
  0x31   : > { %v273_v5 = vsub.f32 1.0, %v272_v4  ;;  %p704_p7 = pneg %p703_p3 }
  0x33   : > { %v274_v6 = vmul.f32 %v590_v3, %v273_v5  ;;  %p709_p0 = pnand %p708_p13, %p704_p7 }
  0x35   : > { %v275_v7 = vadd.f32 %v590_v3, %v274_v6 }
  0x37   : > { %v277_v8 = vsel %vm276_vm1, %v590_v3, %v275_v7 }
  0x9c   : > { %v270_v9 = vpop.xlane.xlu0 %269 }
  0x9d   : > { %v278_v10 = vmul.f32 %v277_v8, %v270_v9 }
  0x9f   : > { %v279_v11 = vsub.f32 %v264_v0, %v278_v10 }
  0xa1   : > { %v280_v12 = vmul.f32 %v279_v11, %v279_v11  ;;  %v315_v38 = vmul.f32 %v587_v33, %v279_v11 }
  0xa3   : > { %v281_v13 = vsel %vm267_vm0, %v280_v12, 0.0 }
  0xa4   : > { %282 = vadd.xlane.f32.xlu0 %v281_v13 }
 0x117   : > { %v283_v16 = vpop.xlane.xlu0 %282 }
 0x118   : > { %v284_v17 = vmul.f32 0.032258064, %v283_v16 }
 0x11a   : > { %591 = vrsqrt.f32 %v284_v17  ;;  %vm292_vm2 = vcmp.eq.f32.partialorder %v284_v17, inf  ;;  %v295_v25 = vand.u32 2147483648, %v284_v17  ;;  %vm294_vm3 = vcmp.eq.f32.partialorder %v284_v17, 0.0 }
 0x120   : > { %v592_v18 = vpop.eup %591 }
 0x121   : > { %v286_v19 = vmul.f32 %v592_v18, %v284_v17 }
 0x123   : > { %v287_v20 = vmul.f32 %v592_v18, %v286_v19 }
 0x125   : > { %v288_v21 = vmul.f32 0.5, %v287_v20 }
 0x127   : > { %v289_v22 = vsub.f32 1.5, %v288_v21 }
 0x129   : > { %v290_v23 = vmul.f32 %v592_v18, %v289_v22 }
 0x12b   : > { %v291_v24 = vmul.f32 %v290_v23, %v284_v17 }
 0x12d   : > { %v293_v26 = vsel %vm292_vm2, %v284_v17, %v291_v24 }
 0x12e   : > { %v296_v27 = vsel %vm294_vm3, %v295_v25, %v293_v26 }
 0x12f   : > { %v297_v28 = vadd.f32 1e-06, %v296_v27 }
 0x131   : > { %593 = vrcp.f32 %v297_v28  ;;  %v309_v32 = vand.u32 2147483648, %v297_v28  ;;  %v307_v35 = vand.u32 2147483647, %v297_v28  ;;  %vm303_vm5 = vweird.f32 %v297_v28 }
 0x133   : > { %v310_v37 = vor.u32 1.1754944e-38, %v309_v32  ;;  %vm308_vm7 = vcmp.eq.f32.partialorder %v307_v35, 8.507059e+37 }
 0x137   : > { %v594_v29 = vpop.eup %593 }
 0x138   : > { %v299_v30 = vmul.f32 %v594_v29, %v297_v28  ;;  %vm304_vm4 = vweird.f32 %v594_v29 }
 0x139   : > { %vm305_vm6 = vmor %vm303_vm5, %vm304_vm4 }
 0x13a   : > { %v300_v31 = vsub.f32 1.0, %v299_v30 }
 0x13c   : > { %v301_v34 = vmul.f32 %v594_v29, %v300_v31 }
 0x13e   : > { %v302_v36 = vadd.f32 %v594_v29, %v301_v34 }
 0x140   : > { %v306_v39 = vsel %vm305_vm6, %v594_v29, %v302_v36 }
 0x141   : > { %v311_v41 = vsel %vm308_vm7, %v310_v37, %v306_v39 }
 0x142   : > { %v316_v42 = vmul.f32 %v315_v38, %v311_v41 }
 0x144   : > { %v320_v43 = vadd.f32 %v588_v40, %v316_v42 }
 0x146   : > { %v321_v44 = vpack.c.bf16 %v320_v43, %v320_v43 }
 0x148   : > { %494 = vmatmul.msk.bf16.vlgmr.msra.gmra.mxu0 %vm267_vm0, %v321_v44 }
 0x1c5   : > { %v350_v45 = vpop.f32.mrf.mxu0 }
 0x1c6   : > { %v354_v46 = vpack.c.bf16 %v350_v45, %v350_v45 }
 0x1c8   : > { %356 = vst.msk [vmem:[%s262_s7] sm:$0xf] %vm355_vm8, %v354_v46 }
 0x1c9   : > { %712 = shalt.err (!%p709_p0)
}
 0x1ca   : > { %511 = dma.vmem_to_hbm [thread:$0]  (%p879_p2), %s372_s8, 64, %s374_s9, %s358_s10  }
 0x1cd   : > { %v352_v47 = vpop.f32.mrf.mxu0 }
 0x1ce PF: > { %s385_s12 = sand.u32 1, %s751_s15   ;;  %p525_p4 = pnand %p478_p8, %p850_p5 }
 0x1cf   : > { %s386_s29 = scalar_lea.sflag [#allocation4], %s385_s12 }
 0x1d0   : > { %p526_p6 = pneg %p525_p4 }
 0x1d2   : > { %746 = dma.done.wait (%p526_p6), %s386_s29, 64  }
 0x1d3   : > { %748 = vsyncadd (%p526_p6), %s386_s29, 4294967232  ;;  %s21_s20 = sadd.s32 1, %s771_s20   ;;  %s966_s15 = smov %s755_s16 }
 0x1d4   : > { %p18_p9 = scmp.ge.s32.totalorder %s21_s20, 4   ;;  %s967_s16 = smov %s759_s17 }
 0x1d5   : > { %s968_s17 = smov %s889_s30  ;;  %s969_s18 = smov %s767_s19 }
 0x1d6   : > { %s970_s19 = smov %s972_s13  ;;  %20 = sbr.rel (!%p18_p9) target bundleno = 7 (0x7), region = 89 }
 0x1db   :  { %392 = vsyncpa [#allocation3], 1 }
 0x1dc   :  { %394 = vsyncpa [#allocation3 + $0x1], 1 }
 0x1dd   :  { %395 = vsyncpa [#allocation6], 1 }
 0x1de   :  { %396 = vsyncpa [#allocation4], 1 }
 0x1df   :  { %398 = vsyncpa [#allocation4 + $0x1], 1 }

// kernel: tpu_custom_call.1
= control target key start
LH: loop header
LB: loop body
LE: loop exit
PB: predicated region body
PF: predicated region fallthrough
CT: control target
= control target key end

     0   :  { %9 = vsyncpa [#allocation3], 0  ;;  %s956_s0 = inlined_call_operand.hbm [shape: f32[2,8,32], index: 0, kind: input, shape index: {}]   ;;  %s957_s1 = inlined_call_operand.hbm [shape: f32[1,32], index: 1, kind: input, shape index: {}]   ;;  %s958_s2 = inlined_call_operand.vmem [shape: f32[1,32], index: 2, kind: input, shape index: {}]   ;;  %s959_s3 = inlined_call_operand.hbm [shape: bf16[32,96], index: 3, kind: input, shape index: {}]   ;;  %s960_s4 = inlined_call_operand.hbm [shape: bf16[2,8,96], index: 4, kind: output, shape index: {}]  }
   0x1   :  { %11 = vsyncpa [#allocation3 + $0x1], 0 }
   0x2   :  { %12 = vsyncpa [#allocation6], 0 }
   0x3   :  { %13 = vsyncpa [#allocation4], 0 }
   0x4   :  { %15 = vsyncpa [#allocation4 + $0x1], 0  ;;  %s803_s15 = smov 0   ;;  %s805_s16 = smov 0  }
   0x5   :  { %s807_s17 = smov 0   ;;  %s809_s18 = smov 0  }
   0x6   :  { %s811_s19 = smov 0   ;;  %s813_s20 = smov 0  }
   0x7 LB: > { %s473_s21 = sadd.s32 4294967295, %s771_s20   ;;  %s474_s22 = sadd.s32 4294967294, %s771_s20   ;;  %s771_s20 = sphi %s813_s20, %s21_s20   ;;  %s767_s19 = sphi %s811_s19, %s970_s19   ;;  %s763_s18 = sphi %s809_s18, %s969_s18   ;;  %s759_s17 = sphi %s807_s17, %s968_s17   ;;  %s755_s16 = sphi %s805_s16, %s967_s16   ;;  %s751_s15 = sphi %s803_s15, %s966_s15  }
   0x8   : > { %p55_p0 = scmp.ne.s32.totalorder %s755_s16, %s751_s15  ;;  %p839_p1 = scmp.eq.s32.totalorder %s473_s21, 0 }
   0x9   : > { %p150_p2 = scmp.eq.s32.totalorder %s474_s22, 1  ;;  %p475_p4 = scmp.ge.s32.totalorder %s771_s20, 1 }
   0xa   : > { %p845_p3 = por %p839_p1, %p55_p0  ;;  %p157_p6 = scmp.lt.s32.totalorder %s771_s20, 3 }
   0xb   : > { %p850_p5 = por %p150_p2, %p55_p0  ;;  %s169_s28 = sshll.u32 %s957_s1, 4  ;;  %s170_s28 = int_to_ptr.hbm [resolvable:$true] %s169_s28 }
   0xc   : > { %p858_p7 = pnand %p475_p4, %p157_p6  ;;  %p478_p8 = scmp.ge.s32.totalorder %s771_s20, 2 }
   0xd   : > { %s773_s30 = smov [#allocation5]   ;;  %s183_s8 = sshll.u32 %s959_s3, 4  ;;  %s184_s8 = int_to_ptr.hbm [resolvable:$true] %s183_s8 }
   0xe   : > { %p513_p9 = pneg %p858_p7  ;;  %s171_s5 = sshll.u32 %s773_s30, 4  ;;  %s172_s5 = int_to_ptr.vmem [resolvable:$true] %s171_s5 }
   0xf   : > { %s774_s9 = smov [#allocation7]   ;;  %s775_s11 = smov 64  }
  0x10   : > { %p514_p10 = pnand %p513_p9, %p839_p1  ;;  %s185_s10 = sshll.u32 %s774_s9, 4  ;;  %s186_s10 = int_to_ptr.vmem [resolvable:$true] %s185_s10 }
  0x11   : > { %s776_s12 = smov 4   ;;  %p144_p11 = scmp.eq.s32.totalorder %s473_s21, 1 }
  0x12   : > { %516 = dma.hbm_to_vmem [thread:$0]  (!%p514_p10), %s170_s28, 16, %s172_s5, [#allocation6]  }
  0x13   : > { %519 = dma.hbm_to_vmem [thread:$0]  (!%p514_p10), %s184_s8, 256, %s186_s10, [#allocation6], %s775_s11, %s775_s11, %s776_s12  }
  0x14   : > { %s33_s13 = sadd.s32 1, %s767_s19  ;;  %s42_s14 = sadd.s32 1, %s759_s17 }
  0x15   : > { %p35_p12 = scmp.ge.s32.totalorder %s33_s13, 2  ;;  %p49_p13 = scmp.ne.s32.totalorder %s759_s17, %s755_s16 }
  0x16   : > { %p50_p0 = scmp.eq.s32.totalorder %s771_s20, 0  ;;  %p530_p4 = scmp.lt.s32.totalorder %s771_s20, 2 }
  0x17   : > { %s972_s13 = smov (%p35_p12, %s33_s13), 0  ;;  %p879_p2 = por %p144_p11, %p49_p13 }
  0x18   : > { %s37_s26 = ssub.s32 %s767_s19, %s972_s13  ;;  %s199_s27 = sand.u32 1, %s759_s17  }
  0x19   : > { %p40_p6 = scmp.eq.s32.totalorder %s37_s26, 0  ;;  %p51_p9 = por %p50_p0, %p49_p13 }
  0x1a   : > { %s479_s28 = sshll.u32 %s199_s27, 3  ;;  %s480_s21 = sshll.u32 %s767_s19, 3 }
  0x1b   : > { %s889_s30 = scalar_select %p40_p6, %s759_s17, %s42_s14  }
  0x1c   : > { %s208_s7 = scalar_lea.hbm %s956_s0, %s480_s21  ;;  %s203_s9 = scalar_lea.vmem [#allocation2], %s479_s28 }
  0x1d   : > { %s210_s8 = sshll.u32 %s208_s7, 4  ;;  %s212_s10 = sshll.u32 %s203_s9, 4  ;;  %s211_s8 = int_to_ptr.hbm [resolvable:$true] %s210_s8  ;;  %s213_s10 = int_to_ptr.vmem [resolvable:$true] %s212_s10 }
  0x1e   : > { %p521_p10 = pnand %p530_p4, %p51_p9  ;;  %s200_s11 = scalar_lea.sflag [#allocation3], %s199_s27 }
  0x1f   : > { %221 = sbr.rel (%p858_p7) target bundleno = 462 (0x1ce), region = 36  ;;  %s899_s12 = sand.u32 (!%p858_p7), 1, %s755_s16  }
  0x20   : > { %523 = dma.hbm_to_vmem [thread:$0]  (!%p521_p10), %s211_s8, 128, %s213_s10, %s200_s11  }
  0x21   : > { %s482_s14 = sshll.u32 (!%p858_p7), %s899_s12, 3  ;;  %s224_s26 = scalar_lea.sflag (!%p858_p7), [#allocation3], %s899_s12 }
  0x22   : > { %s227_s21 = scalar_lea.vmem (!%p858_p7), [#allocation2], %s482_s14 }
  0x24   : > { %738 = dma.done.wait (%p845_p3), %s224_s26, 128  }
  0x25   : > { %740 = vsyncadd (%p845_p3), %s224_s26, 4294967168 }
  0x26   : > { %742 = dma.done.wait (%p839_p1), [#allocation6], 272  }
  0x27   : > { %744 = vsyncadd (%p839_p1), [#allocation6], 4294967024  ;;  %vm267_vm0 = vcmask 261120   ;;  %v264_v0 = vld [vmem:[%s227_s21] sm:$0xff]  ;;  %v777_v2 = vmov 32.0   ;;  %v499_v15 = vld [vmem:[#allocation7] sm:$0xff] }
  0x28   : > { %v268_v1 = vsel %vm267_vm0, %v264_v0, 0.0  ;;  %589 = vrcp.f32 %v777_v2  ;;  %v500_v14 = vld [vmem:[#allocation7 + $0x8] sm:$0xff]  ;;  %v587_v33 = vld [vmem:[#allocation5] ss:$0 sm:$0xff]  ;;  %s496_s29 = sshll.u32 %s763_s18, 2  ;;  %s485_s27 = sshll.u32 %s899_s12, 2 }
  0x29   : > { %269 = vadd.xlane.f32.xlu0 %v268_v1  ;;  %347 = vmatpush.bf16.msra.mxu0 %v500_v14  ;;  %v588_v40 = vld [vmem:[%s958_s2] ss:$0 sm:$0xff]  ;;  %s369_s6 = scalar_lea.hbm %s960_s4, %s496_s29  ;;  %s262_s7 = scalar_lea.vmem [#allocation8], %s485_s27  ;;  %vm355_vm8 = vcmask 781312  }
  0x2a   : > { %s371_s8 = sshll.u32 %s262_s7, 4  ;;  %s373_s9 = sshll.u32 %s369_s6, 4  ;;  %s372_s8 = int_to_ptr.vmem [resolvable:$true] %s371_s8  ;;  %s374_s9 = int_to_ptr.hbm [resolvable:$true] %s373_s9 }
  0x2b   : > { %s358_s10 = scalar_lea.sflag [#allocation4], %s899_s12  ;;  %s699_s11 = sshra.s32 %s374_s9, 4  ;;  %s700_s11 = int_to_ptr.hbm [resolvable:$true] %s699_s11 }
  0x2c   : > { %s701_s14 = scalar_lea.hbm %s700_s11, 4  ;;  %s705_s21 = scalar_lea.hbm %s960_s4, 8 }
  0x2d   : > { %348 = vmatpush.bf16.msra.mxu0 %v499_v15  ;;  %p702_p1 = scmp.ne.s32.totalorder %s700_s11, %s701_s14  ;;  %p706_p11 = scmp.lt.s32.totalorder %s700_s11, %s960_s4 }
  0x2e   : > { %v590_v3 = vpop.eup %589  ;;  %p707_p12 = scmp.lt.s32.totalorder %s705_s21, %s701_s14 }
  0x2f   : > { %v272_v4 = vmul.f32 32.0, %v590_v3  ;;  %vm276_vm1 = vweird.f32 %v590_v3  ;;  %p703_p3 = pnand %p702_p1, %p879_p2 }
  0x30   : > { %p708_p13 = por %p707_p12, %p706_p11 }
  0x31   : > { %v273_v5 = vsub.f32 1.0, %v272_v4  ;;  %p704_p7 = pneg %p703_p3 }
  0x33   : > { %v274_v6 = vmul.f32 %v590_v3, %v273_v5  ;;  %p709_p0 = pnand %p708_p13, %p704_p7 }
  0x35   : > { %v275_v7 = vadd.f32 %v590_v3, %v274_v6 }
  0x37   : > { %v277_v8 = vsel %vm276_vm1, %v590_v3, %v275_v7 }
  0x9c   : > { %v270_v9 = vpop.xlane.xlu0 %269 }
  0x9d   : > { %v278_v10 = vmul.f32 %v277_v8, %v270_v9 }
  0x9f   : > { %v279_v11 = vsub.f32 %v264_v0, %v278_v10 }
  0xa1   : > { %v280_v12 = vmul.f32 %v279_v11, %v279_v11  ;;  %v315_v38 = vmul.f32 %v587_v33, %v279_v11 }
  0xa3   : > { %v281_v13 = vsel %vm267_vm0, %v280_v12, 0.0 }
  0xa4   : > { %282 = vadd.xlane.f32.xlu0 %v281_v13 }
 0x117   : > { %v283_v16 = vpop.xlane.xlu0 %282 }
 0x118   : > { %v284_v17 = vmul.f32 0.032258064, %v283_v16 }
 0x11a   : > { %591 = vrsqrt.f32 %v284_v17  ;;  %vm292_vm2 = vcmp.eq.f32.partialorder %v284_v17, inf  ;;  %v295_v25 = vand.u32 2147483648, %v284_v17  ;;  %vm294_vm3 = vcmp.eq.f32.partialorder %v284_v17, 0.0 }
 0x120   : > { %v592_v18 = vpop.eup %591 }
 0x121   : > { %v286_v19 = vmul.f32 %v592_v18, %v284_v17 }
 0x123   : > { %v287_v20 = vmul.f32 %v592_v18, %v286_v19 }
 0x125   : > { %v288_v21 = vmul.f32 0.5, %v287_v20 }
 0x127   : > { %v289_v22 = vsub.f32 1.5, %v288_v21 }
 0x129   : > { %v290_v23 = vmul.f32 %v592_v18, %v289_v22 }
 0x12b   : > { %v291_v24 = vmul.f32 %v290_v23, %v284_v17 }
 0x12d   : > { %v293_v26 = vsel %vm292_vm2, %v284_v17, %v291_v24 }
 0x12e   : > { %v296_v27 = vsel %vm294_vm3, %v295_v25, %v293_v26 }
 0x12f   : > { %v297_v28 = vadd.f32 1e-06, %v296_v27 }
 0x131   : > { %593 = vrcp.f32 %v297_v28  ;;  %v309_v32 = vand.u32 2147483648, %v297_v28  ;;  %v307_v35 = vand.u32 2147483647, %v297_v28  ;;  %vm303_vm5 = vweird.f32 %v297_v28 }
 0x133   : > { %v310_v37 = vor.u32 1.1754944e-38, %v309_v32  ;;  %vm308_vm7 = vcmp.eq.f32.partialorder %v307_v35, 8.507059e+37 }
 0x137   : > { %v594_v29 = vpop.eup %593 }
 0x138   : > { %v299_v30 = vmul.f32 %v594_v29, %v297_v28  ;;  %vm304_vm4 = vweird.f32 %v594_v29 }
 0x139   : > { %vm305_vm6 = vmor %vm303_vm5, %vm304_vm4 }
 0x13a   : > { %v300_v31 = vsub.f32 1.0, %v299_v30 }
 0x13c   : > { %v301_v34 = vmul.f32 %v594_v29, %v300_v31 }
 0x13e   : > { %v302_v36 = vadd.f32 %v594_v29, %v301_v34 }
 0x140   : > { %v306_v39 = vsel %vm305_vm6, %v594_v29, %v302_v36 }
 0x141   : > { %v311_v41 = vsel %vm308_vm7, %v310_v37, %v306_v39 }
 0x142   : > { %v316_v42 = vmul.f32 %v315_v38, %v311_v41 }
 0x144   : > { %v320_v43 = vadd.f32 %v588_v40, %v316_v42 }
 0x146   : > { %v321_v44 = vpack.c.bf16 %v320_v43, %v320_v43 }
 0x148   : > { %494 = vmatmul.msk.bf16.vlgmr.msra.gmra.mxu0 %vm267_vm0, %v321_v44 }
 0x1c5   : > { %v350_v45 = vpop.f32.mrf.mxu0 }
 0x1c6   : > { %v354_v46 = vpack.c.bf16 %v350_v45, %v350_v45 }
 0x1c8   : > { %356 = vst.msk [vmem:[%s262_s7] sm:$0xf] %vm355_vm8, %v354_v46 }
 0x1c9   : > { %712 = shalt.err (!%p709_p0)
}
 0x1ca   : > { %511 = dma.vmem_to_hbm [thread:$0]  (%p879_p2), %s372_s8, 64, %s374_s9, %s358_s10  }
 0x1cd   : > { %v352_v47 = vpop.f32.mrf.mxu0 }
 0x1ce PF: > { %s385_s12 = sand.u32 1, %s751_s15   ;;  %p525_p4 = pnand %p478_p8, %p850_p5 }
 0x1cf   : > { %s386_s29 = scalar_lea.sflag [#allocation4], %s385_s12 }
 0x1d0   : > { %p526_p6 = pneg %p525_p4 }
 0x1d2   : > { %746 = dma.done.wait (%p526_p6), %s386_s29, 64  }
 0x1d3   : > { %748 = vsyncadd (%p526_p6), %s386_s29, 4294967232  ;;  %s21_s20 = sadd.s32 1, %s771_s20   ;;  %s966_s15 = smov %s755_s16 }
 0x1d4   : > { %p18_p9 = scmp.ge.s32.totalorder %s21_s20, 4   ;;  %s967_s16 = smov %s759_s17 }
 0x1d5   : > { %s968_s17 = smov %s889_s30  ;;  %s969_s18 = smov %s767_s19 }
 0x1d6   : > { %s970_s19 = smov %s972_s13  ;;  %20 = sbr.rel (!%p18_p9) target bundleno = 7 (0x7), region = 89 }
 0x1db   :  { %392 = vsyncpa [#allocation3], 1 }
 0x1dc   :  { %394 = vsyncpa [#allocation3 + $0x1], 1 }
 0x1dd   :  { %395 = vsyncpa [#allocation6], 1 }
 0x1de   :  { %396 = vsyncpa [#allocation4], 1 }
 0x1df   :  { %398 = vsyncpa [#allocation4 + $0x1], 1 }

</bundles_post_ra>
